<compile_context>
chip_gen: v7x
topology: tpu7x:2x2x1
jax: 0.10.0
libtpu: 0.0.40
codegen_flags: <defaults>
</compile_context>

<pallas_src>
import math
import functools

import jax
import jax.numpy as jnp
from jax import lax
from jax.experimental import pallas as pl
from jax.experimental.pallas import tpu as pltpu


def _attention_body(h_ref, c_ref, wq_ref, bq_ref, wkv_ref, bkv_ref,
                    mask, o_ref, kv_scr, acc_scr,
                    *, num_heads, head_dim, hidden, scale):
    # h_ref:   (1, tq, H) bf16      c_ref: (1, Sk, H) bf16
    # wq_ref:  (H, H) bf16 (pre-transposed: y = x @ W + b)   bq_ref: (1, H) f32
    # wkv_ref: (H, 2H) bf16 ([Wk | Wv])                      bkv_ref: (1, 2H) f32
    # mask:    (tq, Sk) / (1, Sk) f32 additive mask, or None
    # o_ref:   (1, tq, H)
    # kv_scr:  (Sk, 2H) bf16 scratch (K/V projections, cached across q tiles)
    # acc_scr: (tq, H) f32 scratch (head-major output accumulator)

    # K/V projections: computed only on the first q tile of each batch element; they
    # stay resident in scratch for the remaining q tiles (q-tile axis is "arbitrary").
    @pl.when(pl.program_id(1) == 0)
    def _():
        c = c_ref[0]                                                 # (Sk, H) bf16
        kv = jnp.dot(c, wkv_ref[...],
                     preferred_element_type=jnp.float32) + bkv_ref[...]
        kv_scr[...] = kv.astype(jnp.bfloat16)

    # Q projection for this q tile (full H x H contraction -> good MXU shape).
    # Fold the softmax scale into Q once (instead of scaling each score matrix).
    h = h_ref[0]                                                     # (tq, H) bf16
    q = jnp.dot(h, wq_ref[...], preferred_element_type=jnp.float32) + bq_ref[...]
    qb = (q * scale).astype(jnp.bfloat16)                            # (tq, H)

    if mask is not None:
        # Broadcast once, outside the unrolled head loop (JAX won't CSE broadcasts).
        mask_b = jnp.broadcast_to(mask, (qb.shape[0], mask.shape[-1]))  # (tq, Sk)

    for hidx in range(num_heads):
        lo = hidx * head_dim
        hi = lo + head_dim
        qh = qb[:, lo:hi]                                            # (tq, hd) bf16
        kh = kv_scr[:, lo:hi]                                        # (Sk, hd) bf16
        vh = kv_scr[:, hidden + lo:hidden + hi]                      # (Sk, hd) bf16

        # scores = (qh/scale_denom) @ kh^T  (+ mask), f32 accumulation/softmax
        s = lax.dot_general(qh, kh, (((1,), (1,)), ((), ())),
                            preferred_element_type=jnp.float32)      # (tq, Sk)
        if mask is not None:
            s = s + mask_b

        m = jnp.max(s, axis=-1, keepdims=True)
        e = jnp.exp(s - m)
        denom = jnp.sum(e, axis=-1, keepdims=True)
        p = e * pl.reciprocal(denom, approx=True)                    # EUP, ~free

        ctx = jnp.dot(p.astype(jnp.bfloat16), vh,
                      preferred_element_type=jnp.float32)            # (tq, hd)
        acc_scr[:, lo:hi] = ctx

    # Single lane-dense store of the whole (tq, H) head-major tile.
    o_ref[0] = acc_scr[...].astype(o_ref.dtype)


def _kernel_masked(h_ref, c_ref, wq_ref, bq_ref, wkv_ref, bkv_ref,
                   mask_ref, o_ref, kv_scr, acc_scr, **kw):
    _attention_body(h_ref, c_ref, wq_ref, bq_ref, wkv_ref, bkv_ref,
                    mask_ref[0], o_ref, kv_scr, acc_scr, **kw)


def _kernel_unmasked(h_ref, c_ref, wq_ref, bq_ref, wkv_ref, bkv_ref,
                     o_ref, kv_scr, acc_scr, **kw):
    _attention_body(h_ref, c_ref, wq_ref, bq_ref, wkv_ref, bkv_ref,
                    None, o_ref, kv_scr, acc_scr, **kw)


def _pick_q_tile(S, target):
    """Largest divisor of S that is <= target and a multiple of 8 (or S itself)."""
    if S <= target:
        return S
    for t in range(min(target, S), 0, -1):
        if S % t == 0 and t % 8 == 0:
            return t
    return S


def bert_attention(hidden_states, context, wq, bq, wk, bk, wv, bv,
                   num_heads, attention_mask=None, q_tile=256):
    """hidden_states: (B, Sq, H); context: (B, Sk, H);
    wq/wk/wv: (H, H) pre-transposed so y = x @ W + b; bq/bk/bv: (H,).
    attention_mask: None or additive mask broadcastable to (B, 1, Sq, Sk)."""
    B, Sq, H = hidden_states.shape
    _, Sk, _ = context.shape
    head_dim = H // num_heads
    scale = 1.0 / math.sqrt(head_dim + 1e-05)
    out_dtype = hidden_states.dtype

    tq = _pick_q_tile(Sq, q_tile)
    n_qt = Sq // tq

    # bf16 MXU operands (in a real model these would already live in bf16).
    h_bf = hidden_states.astype(jnp.bfloat16)
    c_bf = context.astype(jnp.bfloat16)
    wq_bf = wq.astype(jnp.bfloat16)
    # Fused K/V projection weight: one (Sk,H)@(H,2H) matmul instead of two.
    wkv_bf = jnp.concatenate([wk, wv], axis=1).astype(jnp.bfloat16)     # (H, 2H)
    bq2 = bq.reshape(1, H).astype(jnp.float32)
    bkv2 = jnp.concatenate([bk, bv]).reshape(1, 2 * H).astype(jnp.float32)

    in_specs = [
        pl.BlockSpec((1, tq, H), lambda b, qi: (b, qi, 0)),     # hidden_states q tile
        pl.BlockSpec((1, Sk, H), lambda b, qi: (b, 0, 0)),      # context (resident over qi)
        pl.BlockSpec((H, H), lambda b, qi: (0, 0)),             # Wq (resident)
        pl.BlockSpec((1, H), lambda b, qi: (0, 0)),             # bq
        pl.BlockSpec((H, 2 * H), lambda b, qi: (0, 0)),         # [Wk | Wv] (resident)
        pl.BlockSpec((1, 2 * H), lambda b, qi: (0, 0)),         # [bk | bv]
    ]
    inputs = [h_bf, c_bf, wq_bf, bq2, wkv_bf, bkv2]

    if attention_mask is not None:
        am = jnp.asarray(attention_mask, jnp.float32)
        am = jnp.reshape(am, (1,) * (4 - am.ndim) + tuple(am.shape))  # pad to 4D
        if am.shape[1] != 1:
            # TODO(synk): per-head attention masks are not supported by this kernel.
            raise NotImplementedError("per-head attention masks not supported")
        Bm = B if am.shape[0] != 1 else 1
        Qm = Sq if am.shape[2] != 1 else 1
        am3 = jnp.broadcast_to(am[:, 0, :, :], (Bm, Qm, Sk))    # no Sq blow-up if mask q-dim is 1
        mq_blk = tq if Qm == Sq else 1

        def mask_index(b, qi, _Bm=Bm, _Qm=Qm):
            return (b if _Bm > 1 else 0, qi if _Qm > 1 else 0, 0)

        in_specs.append(pl.BlockSpec((1, mq_blk, Sk), mask_index))
        inputs.append(am3)
        kernel = _kernel_masked
    else:
        kernel = _kernel_unmasked

    kernel = functools.partial(kernel, num_heads=num_heads,
                               head_dim=head_dim, hidden=H, scale=scale)

    grid_spec = pltpu.PrefetchScalarGridSpec(
        num_scalar_prefetch=0,
        grid=(B, n_qt),
        in_specs=in_specs,
        out_specs=pl.BlockSpec((1, tq, H), lambda b, qi: (b, qi, 0)),
        scratch_shapes=[
            pltpu.VMEM((Sk, 2 * H), jnp.bfloat16),   # fused K/V projection cache
            pltpu.VMEM((tq, H), jnp.float32),        # head-major output accumulator
        ],
    )

    return pl.pallas_call(
        kernel,
        out_shape=jax.ShapeDtypeStruct((B, Sq, H), out_dtype),
        grid_spec=grid_spec,
        compiler_params=pltpu.CompilerParams(
            # Batch axis parallel (megacore); q-tile axis arbitrary because the K/V
            # projection cache is carried across q tiles of the same batch element.
            dimension_semantics=("parallel", "arbitrary"),
            vmem_limit_bytes=64 * 1024 * 1024,
        ),
    )(*inputs)


def _round_bf16(x):
    return x.astype(jnp.bfloat16).astype(jnp.float32)


def _reference(hidden_states, context, wq, bq, wk, bk, wv, bv, num_heads,
               attention_mask=None):
    """Plain-JAX reference mirroring the PyTorch forward (eval mode), with the same
    bf16 operand rounding the kernel uses so tolerances stay tight."""
    B, Sq, H = hidden_states.shape
    _, Sk, _ = context.shape
    hd = H // num_heads
    h = _round_bf16(hidden_states)
    c = _round_bf16(context)
    wq_, wk_, wv_ = _round_bf16(wq), _round_bf16(wk), _round_bf16(wv)
    q = h @ wq_ + bq
    k = c @ wk_ + bk
    v = c @ wv_ + bv

    def split(x, S):
        return x.reshape(B, S, num_heads, hd).transpose(0, 2, 1, 3)

    q, k, v = split(_round_bf16(q), Sq), split(_round_bf16(k), Sk), split(_round_bf16(v), Sk)
    s = jnp.einsum('bhqd,bhkd->bhqk', q, k) / math.sqrt(hd + 1e-05)
    if attention_mask is not None:
        s = s + attention_mask
    p = jax.nn.softmax(s, axis=-1)
    ctx = jnp.einsum('bhqk,bhkd->bhqd', _round_bf16(p), v)
    return ctx.transpose(0, 2, 1, 3).reshape(B, Sq, H)


if __name__ == "__main__":
    B, Sq, Sk = 2, 8, 8
    hidden_size, num_heads = 32, 4

    key = jax.random.PRNGKey(0)
    keys = jax.random.split(key, 8)
    hidden_states = jax.random.normal(keys[0], (B, Sq, hidden_size), jnp.float32)
    context = jax.random.normal(keys[1], (B, Sk, hidden_size), jnp.float32)

    # nn.Linear(hidden, hidden) weights; stored pre-transposed so y = x @ W + b.
    bound = 1.0 / math.sqrt(hidden_size)
    wq = jax.random.uniform(keys[2], (hidden_size, hidden_size), jnp.float32, -bound, bound)
    wk = jax.random.uniform(keys[3], (hidden_size, hidden_size), jnp.float32, -bound, bound)
    wv = jax.random.uniform(keys[4], (hidden_size, hidden_size), jnp.float32, -bound, bound)
    bq = jax.random.uniform(keys[5], (hidden_size,), jnp.float32, -bound, bound)
    bk = jax.random.uniform(keys[6], (hidden_size,), jnp.float32, -bound, bound)
    bv = jax.random.uniform(keys[7], (hidden_size,), jnp.float32, -bound, bound)

    # Padding-style additive mask (B, 1, 1, Sk): mask out the last two keys.
    mask = jnp.where(jnp.arange(Sk)[None, None, None, :] < Sk - 2, 0.0, -10000.0)
    mask = jnp.broadcast_to(mask.astype(jnp.float32), (B, 1, 1, Sk))

    # Masked path
    out_m = bert_attention(hidden_states, context, wq, bq, wk, bk, wv, bv,
                           num_heads, attention_mask=mask)
    out_m = jax.block_until_ready(out_m)
    ref_m = _reference(hidden_states, context, wq, bq, wk, bk, wv, bv,
                       num_heads, attention_mask=mask)
    assert out_m.shape == (B, Sq, hidden_size)
    assert jnp.allclose(out_m, ref_m, atol=2e-2, rtol=2e-2), "masked mismatch vs reference"

    # Unmasked path
    out_n = bert_attention(hidden_states, context, wq, bq, wk, bk, wv, bv,
                           num_heads, attention_mask=None)
    out_n = jax.block_until_ready(out_n)
    ref_n = _reference(hidden_states, context, wq, bq, wk, bk, wv, bv,
                       num_heads, attention_mask=None)
    assert out_n.shape == (B, Sq, hidden_size)
    assert jnp.allclose(out_n, ref_n, atol=2e-2, rtol=2e-2), "unmasked mismatch vs reference"

    print("KERNEL_OK")
</pallas_src>

<mosaic_0001>
module attributes {stable_mosaic.version = 11 : i64} {
  func.func @_kernel_masked(%arg0: i32, %arg1: i32, %arg2: memref<1x8x32xbf16, #tpu.memory_space<vmem>>, %arg3: memref<1x8x32xbf16, #tpu.memory_space<vmem>>, %arg4: memref<32x32xbf16, #tpu.memory_space<vmem>>, %arg5: memref<1x32xf32, #tpu.memory_space<vmem>>, %arg6: memref<32x64xbf16, #tpu.memory_space<vmem>>, %arg7: memref<1x64xf32, #tpu.memory_space<vmem>>, %arg8: memref<1x1x8xf32, #tpu.memory_space<vmem>>, %arg9: memref<1x8x32xf32, #tpu.memory_space<vmem>>, %arg10: memref<8x64xbf16, #tpu.memory_space<vmem>>, %arg11: memref<8x32xf32, #tpu.memory_space<vmem>>) attributes {dimension_semantics = [#tpu.dimension_semantics<parallel>, #tpu.dimension_semantics<arbitrary>], iteration_bounds = array<i64: 2, 1>, scalar_prefetch = 0 : i64, scratch_operands = 2 : i64, tpu.core_type = #tpu.core_type<tc>, window_params = [{transform_indices = @transform_0, window_bounds = array<i64: 1, 8, 32>}, {transform_indices = @transform_1, window_bounds = array<i64: 1, 8, 32>}, {pipeline_mode = #tpu.pipeline_mode<synchronous>, transform_indices = @transform_2, window_bounds = array<i64: 32, 32>}, {pipeline_mode = #tpu.pipeline_mode<synchronous>, transform_indices = @transform_3, window_bounds = array<i64: 1, 32>}, {pipeline_mode = #tpu.pipeline_mode<synchronous>, transform_indices = @transform_4, window_bounds = array<i64: 32, 64>}, {pipeline_mode = #tpu.pipeline_mode<synchronous>, transform_indices = @transform_5, window_bounds = array<i64: 1, 64>}, {transform_indices = @transform_6, window_bounds = array<i64: 1, 1, 8>}, {transform_indices = @transform_7, window_bounds = array<i64: 1, 8, 32>}]} {
    %c0 = arith.constant 0 : index
    %c0_0 = arith.constant 0 : index
    %c0_1 = arith.constant 0 : index
    %0 = vector.load %arg8[%c0, %c0_0, %c0_1] : memref<1x1x8xf32, #tpu.memory_space<vmem>>, vector<1x1x8xf32>
    %1 = vector.shape_cast %0 : vector<1x1x8xf32> to vector<1x8xf32>
    %c0_i32 = arith.constant 0 : i32
    %2 = arith.cmpi eq, %arg1, %c0_i32 : i32
    %3 = arith.extui %2 : i1 to i32
    %c0_i32_2 = arith.constant 0 : i32
    %4 = arith.cmpi ne, %3, %c0_i32_2 : i32
    scf.if %4 {
      %c0_49 = arith.constant 0 : index
      %c0_50 = arith.constant 0 : index
      %c0_51 = arith.constant 0 : index
      %93 = vector.load %arg3[%c0_49, %c0_50, %c0_51] : memref<1x8x32xbf16, #tpu.memory_space<vmem>>, vector<1x8x32xbf16>
      %94 = vector.shape_cast %93 : vector<1x8x32xbf16> to vector<8x32xbf16>
      %c0_52 = arith.constant 0 : index
      %c0_53 = arith.constant 0 : index
      %95 = vector.load %arg6[%c0_52, %c0_53] : memref<32x64xbf16, #tpu.memory_space<vmem>>, vector<32x64xbf16>
      %cst_54 = arith.constant dense<0.000000e+00> : vector<8x64xf32>
      %96 = tpu.matmul %94, %95, %cst_54 {dimension_numbers = #tpu.dot_dimension_numbers<[1], [0], [0], [1], [0, 0, 1, 1], [], []>} : vector<8x32xbf16>, vector<32x64xbf16>, vector<8x64xf32> -> vector<8x64xf32>
      %c0_55 = arith.constant 0 : index
      %c0_56 = arith.constant 0 : index
      %97 = vector.load %arg7[%c0_55, %c0_56] : memref<1x64xf32, #tpu.memory_space<vmem>>, vector<1x64xf32>
      %98 = vector.broadcast %97 : vector<1x64xf32> to vector<8x64xf32>
      %99 = arith.addf %96, %98 : vector<8x64xf32>
      %100 = arith.truncf %99 : vector<8x64xf32> to vector<8x64xbf16>
      %c0_57 = arith.constant 0 : index
      %c0_58 = arith.constant 0 : index
      %101 = vector.load %arg10[%c0_57, %c0_58] : memref<8x64xbf16, #tpu.memory_space<vmem>>, vector<8x64xbf16>
      tpu.vector_store %arg10[%c0_57, %c0_58], %100 {strides = array<i32>} : memref<8x64xbf16, #tpu.memory_space<vmem>>, vector<8x64xbf16>,
    } else {
    }
    %c0_3 = arith.constant 0 : index
    %c0_4 = arith.constant 0 : index
    %c0_5 = arith.constant 0 : index
    %5 = vector.load %arg2[%c0_3, %c0_4, %c0_5] : memref<1x8x32xbf16, #tpu.memory_space<vmem>>, vector<1x8x32xbf16>
    %6 = vector.shape_cast %5 : vector<1x8x32xbf16> to vector<8x32xbf16>
    %c0_6 = arith.constant 0 : index
    %c0_7 = arith.constant 0 : index
    %7 = vector.load %arg4[%c0_6, %c0_7] : memref<32x32xbf16, #tpu.memory_space<vmem>>, vector<32x32xbf16>
    %cst = arith.constant dense<0.000000e+00> : vector<8x32xf32>
    %8 = tpu.matmul %6, %7, %cst {dimension_numbers = #tpu.dot_dimension_numbers<[1], [0], [0], [1], [0, 0, 1, 1], [], []>} : vector<8x32xbf16>, vector<32x32xbf16>, vector<8x32xf32> -> vector<8x32xf32>
    %c0_8 = arith.constant 0 : index
    %c0_9 = arith.constant 0 : index
    %9 = vector.load %arg5[%c0_8, %c0_9] : memref<1x32xf32, #tpu.memory_space<vmem>>, vector<1x32xf32>
    %10 = vector.broadcast %9 : vector<1x32xf32> to vector<8x32xf32>
    %11 = arith.addf %8, %10 : vector<8x32xf32>
    %cst_10 = arith.constant 0.353553176 : f32
    %12 = vector.broadcast %cst_10 : f32 to vector<8x32xf32>
    %13 = arith.mulf %11, %12 : vector<8x32xf32>
    %14 = arith.truncf %13 : vector<8x32xf32> to vector<8x32xbf16>
    %15 = vector.shape_cast %1 : vector<1x8xf32> to vector<1x8xf32>
    %16 = vector.broadcast %15 : vector<1x8xf32> to vector<8x8xf32>
    %17 = vector.extract_strided_slice %14 {offsets = [0, 0], sizes = [8, 8], strides = [1, 1]} : vector<8x32xbf16> to vector<8x8xbf16>
    %c0_11 = arith.constant 0 : index
    %c0_12 = arith.constant 0 : index
    %18 = vector.load %arg10[%c0_11, %c0_12] : memref<8x64xbf16, #tpu.memory_space<vmem>>, vector<8x8xbf16>
    %c0_13 = arith.constant 0 : index
    %c32 = arith.constant 32 : index
    %19 = vector.load %arg10[%c0_13, %c32] : memref<8x64xbf16, #tpu.memory_space<vmem>>, vector<8x8xbf16>
    %cst_14 = arith.constant dense<0.000000e+00> : vector<8x8xf32>
    %20 = tpu.matmul %17, %18, %cst_14 {dimension_numbers = #tpu.dot_dimension_numbers<[1], [1], [0], [0], [0, 0, 1, 0], [], []>} : vector<8x8xbf16>, vector<8x8xbf16>, vector<8x8xf32> -> vector<8x8xf32>
    %21 = arith.addf %20, %16 : vector<8x8xf32>
    %cst_15 = arith.constant dense<0xFF800000> : vector<8xf32>
    %22 = vector.multi_reduction <maximumf>, %21, %cst_15 [1] : vector<8x8xf32> to vector<8xf32>
    %23 = vector.shape_cast %22 : vector<8xf32> to vector<8x1xf32>
    %24 = vector.broadcast %23 : vector<8x1xf32> to vector<8x8xf32>
    %25 = arith.subf %21, %24 : vector<8x8xf32>
    %26 = math.exp %25 : vector<8x8xf32>
    %cst_16 = arith.constant dense<0.000000e+00> : vector<8xf32>
    %27 = vector.multi_reduction <add>, %26, %cst_16 [1] : vector<8x8xf32> to vector<8xf32>
    %28 = vector.shape_cast %27 : vector<8xf32> to vector<8x1xf32>
    %29 = tpu.reciprocal %28 {approx = true} : vector<8x1xf32> -> vector<8x1xf32>
    %30 = vector.broadcast %29 : vector<8x1xf32> to vector<8x8xf32>
    %31 = arith.mulf %26, %30 : vector<8x8xf32>
    %32 = arith.truncf %31 : vector<8x8xf32> to vector<8x8xbf16>
    %cst_17 = arith.constant dense<0.000000e+00> : vector<8x8xf32>
    %33 = tpu.matmul %32, %19, %cst_17 {dimension_numbers = #tpu.dot_dimension_numbers<[1], [0], [0], [1], [0, 0, 1, 1], [], []>} : vector<8x8xbf16>, vector<8x8xbf16>, vector<8x8xf32> -> vector<8x8xf32>
    %c0_18 = arith.constant 0 : index
    %c0_19 = arith.constant 0 : index
    %34 = vector.load %arg11[%c0_18, %c0_19] : memref<8x32xf32, #tpu.memory_space<vmem>>, vector<8x8xf32>
    tpu.vector_store %arg11[%c0_18, %c0_19], %33 {strides = array<i32>} : memref<8x32xf32, #tpu.memory_space<vmem>>, vector<8x8xf32>,
    %35 = vector.extract_strided_slice %14 {offsets = [0, 8], sizes = [8, 8], strides = [1, 1]} : vector<8x32xbf16> to vector<8x8xbf16>
    %c0_20 = arith.constant 0 : index
    %c8 = arith.constant 8 : index
    %36 = vector.load %arg10[%c0_20, %c8] : memref<8x64xbf16, #tpu.memory_space<vmem>>, vector<8x8xbf16>
    %c0_21 = arith.constant 0 : index
    %c40 = arith.constant 40 : index
    %37 = vector.load %arg10[%c0_21, %c40] : memref<8x64xbf16, #tpu.memory_space<vmem>>, vector<8x8xbf16>
    %cst_22 = arith.constant dense<0.000000e+00> : vector<8x8xf32>
    %38 = tpu.matmul %35, %36, %cst_22 {dimension_numbers = #tpu.dot_dimension_numbers<[1], [1], [0], [0], [0, 0, 1, 0], [], []>} : vector<8x8xbf16>, vector<8x8xbf16>, vector<8x8xf32> -> vector<8x8xf32>
    %39 = arith.addf %38, %16 : vector<8x8xf32>
    %cst_23 = arith.constant dense<0xFF800000> : vector<8xf32>
    %40 = vector.multi_reduction <maximumf>, %39, %cst_23 [1] : vector<8x8xf32> to vector<8xf32>
    %41 = vector.shape_cast %40 : vector<8xf32> to vector<8x1xf32>
    %42 = vector.broadcast %41 : vector<8x1xf32> to vector<8x8xf32>
    %43 = arith.subf %39, %42 : vector<8x8xf32>
    %44 = math.exp %43 : vector<8x8xf32>
    %cst_24 = arith.constant dense<0.000000e+00> : vector<8xf32>
    %45 = vector.multi_reduction <add>, %44, %cst_24 [1] : vector<8x8xf32> to vector<8xf32>
    %46 = vector.shape_cast %45 : vector<8xf32> to vector<8x1xf32>
    %47 = tpu.reciprocal %46 {approx = true} : vector<8x1xf32> -> vector<8x1xf32>
    %48 = vector.broadcast %47 : vector<8x1xf32> to vector<8x8xf32>
    %49 = arith.mulf %44, %48 : vector<8x8xf32>
    %50 = arith.truncf %49 : vector<8x8xf32> to vector<8x8xbf16>
    %cst_25 = arith.constant dense<0.000000e+00> : vector<8x8xf32>
    %51 = tpu.matmul %50, %37, %cst_25 {dimension_numbers = #tpu.dot_dimension_numbers<[1], [0], [0], [1], [0, 0, 1, 1], [], []>} : vector<8x8xbf16>, vector<8x8xbf16>, vector<8x8xf32> -> vector<8x8xf32>
    %c0_26 = arith.constant 0 : index
    %c8_27 = arith.constant 8 : index
    %52 = vector.load %arg11[%c0_26, %c8_27] : memref<8x32xf32, #tpu.memory_space<vmem>>, vector<8x8xf32>
    tpu.vector_store %arg11[%c0_26, %c8_27], %51 {strides = array<i32>} : memref<8x32xf32, #tpu.memory_space<vmem>>, vector<8x8xf32>,
    %53 = vector.extract_strided_slice %14 {offsets = [0, 16], sizes = [8, 8], strides = [1, 1]} : vector<8x32xbf16> to vector<8x8xbf16>
    %c0_28 = arith.constant 0 : index
    %c16 = arith.constant 16 : index
    %54 = vector.load %arg10[%c0_28, %c16] : memref<8x64xbf16, #tpu.memory_space<vmem>>, vector<8x8xbf16>
    %c0_29 = arith.constant 0 : index
    %c48 = arith.constant 48 : index
    %55 = vector.load %arg10[%c0_29, %c48] : memref<8x64xbf16, #tpu.memory_space<vmem>>, vector<8x8xbf16>
    %cst_30 = arith.constant dense<0.000000e+00> : vector<8x8xf32>
    %56 = tpu.matmul %53, %54, %cst_30 {dimension_numbers = #tpu.dot_dimension_numbers<[1], [1], [0], [0], [0, 0, 1, 0], [], []>} : vector<8x8xbf16>, vector<8x8xbf16>, vector<8x8xf32> -> vector<8x8xf32>
    %57 = arith.addf %56, %16 : vector<8x8xf32>
    %cst_31 = arith.constant dense<0xFF800000> : vector<8xf32>
    %58 = vector.multi_reduction <maximumf>, %57, %cst_31 [1] : vector<8x8xf32> to vector<8xf32>
    %59 = vector.shape_cast %58 : vector<8xf32> to vector<8x1xf32>
    %60 = vector.broadcast %59 : vector<8x1xf32> to vector<8x8xf32>
    %61 = arith.subf %57, %60 : vector<8x8xf32>
    %62 = math.exp %61 : vector<8x8xf32>
    %cst_32 = arith.constant dense<0.000000e+00> : vector<8xf32>
    %63 = vector.multi_reduction <add>, %62, %cst_32 [1] : vector<8x8xf32> to vector<8xf32>
    %64 = vector.shape_cast %63 : vector<8xf32> to vector<8x1xf32>
    %65 = tpu.reciprocal %64 {approx = true} : vector<8x1xf32> -> vector<8x1xf32>
    %66 = vector.broadcast %65 : vector<8x1xf32> to vector<8x8xf32>
    %67 = arith.mulf %62, %66 : vector<8x8xf32>
    %68 = arith.truncf %67 : vector<8x8xf32> to vector<8x8xbf16>
    %cst_33 = arith.constant dense<0.000000e+00> : vector<8x8xf32>
    %69 = tpu.matmul %68, %55, %cst_33 {dimension_numbers = #tpu.dot_dimension_numbers<[1], [0], [0], [1], [0, 0, 1, 1], [], []>} : vector<8x8xbf16>, vector<8x8xbf16>, vector<8x8xf32> -> vector<8x8xf32>
    %c0_34 = arith.constant 0 : index
    %c16_35 = arith.constant 16 : index
    %70 = vector.load %arg11[%c0_34, %c16_35] : memref<8x32xf32, #tpu.memory_space<vmem>>, vector<8x8xf32>
    tpu.vector_store %arg11[%c0_34, %c16_35], %69 {strides = array<i32>} : memref<8x32xf32, #tpu.memory_space<vmem>>, vector<8x8xf32>,
    %71 = vector.extract_strided_slice %14 {offsets = [0, 24], sizes = [8, 8], strides = [1, 1]} : vector<8x32xbf16> to vector<8x8xbf16>
    %c0_36 = arith.constant 0 : index
    %c24 = arith.constant 24 : index
    %72 = vector.load %arg10[%c0_36, %c24] : memref<8x64xbf16, #tpu.memory_space<vmem>>, vector<8x8xbf16>
    %c0_37 = arith.constant 0 : index
    %c56 = arith.constant 56 : index
    %73 = vector.load %arg10[%c0_37, %c56] : memref<8x64xbf16, #tpu.memory_space<vmem>>, vector<8x8xbf16>
    %cst_38 = arith.constant dense<0.000000e+00> : vector<8x8xf32>
    %74 = tpu.matmul %71, %72, %cst_38 {dimension_numbers = #tpu.dot_dimension_numbers<[1], [1], [0], [0], [0, 0, 1, 0], [], []>} : vector<8x8xbf16>, vector<8x8xbf16>, vector<8x8xf32> -> vector<8x8xf32>
    %75 = arith.addf %74, %16 : vector<8x8xf32>
    %cst_39 = arith.constant dense<0xFF800000> : vector<8xf32>
    %76 = vector.multi_reduction <maximumf>, %75, %cst_39 [1] : vector<8x8xf32> to vector<8xf32>
    %77 = vector.shape_cast %76 : vector<8xf32> to vector<8x1xf32>
    %78 = vector.broadcast %77 : vector<8x1xf32> to vector<8x8xf32>
    %79 = arith.subf %75, %78 : vector<8x8xf32>
    %80 = math.exp %79 : vector<8x8xf32>
    %cst_40 = arith.constant dense<0.000000e+00> : vector<8xf32>
    %81 = vector.multi_reduction <add>, %80, %cst_40 [1] : vector<8x8xf32> to vector<8xf32>
    %82 = vector.shape_cast %81 : vector<8xf32> to vector<8x1xf32>
    %83 = tpu.reciprocal %82 {approx = true} : vector<8x1xf32> -> vector<8x1xf32>
    %84 = vector.broadcast %83 : vector<8x1xf32> to vector<8x8xf32>
    %85 = arith.mulf %80, %84 : vector<8x8xf32>
    %86 = arith.truncf %85 : vector<8x8xf32> to vector<8x8xbf16>
    %cst_41 = arith.constant dense<0.000000e+00> : vector<8x8xf32>
    %87 = tpu.matmul %86, %73, %cst_41 {dimension_numbers = #tpu.dot_dimension_numbers<[1], [0], [0], [1], [0, 0, 1, 1], [], []>} : vector<8x8xbf16>, vector<8x8xbf16>, vector<8x8xf32> -> vector<8x8xf32>
    %c0_42 = arith.constant 0 : index
    %c24_43 = arith.constant 24 : index
    %88 = vector.load %arg11[%c0_42, %c24_43] : memref<8x32xf32, #tpu.memory_space<vmem>>, vector<8x8xf32>
    tpu.vector_store %arg11[%c0_42, %c24_43], %87 {strides = array<i32>} : memref<8x32xf32, #tpu.memory_space<vmem>>, vector<8x8xf32>,
    %c0_44 = arith.constant 0 : index
    %c0_45 = arith.constant 0 : index
    %89 = vector.load %arg11[%c0_44, %c0_45] : memref<8x32xf32, #tpu.memory_space<vmem>>, vector<8x32xf32>
    %c0_46 = arith.constant 0 : index
    %c0_47 = arith.constant 0 : index
    %c0_48 = arith.constant 0 : index
    %90 = vector.load %arg9[%c0_46, %c0_47, %c0_48] : memref<1x8x32xf32, #tpu.memory_space<vmem>>, vector<1x8x32xf32>
    %91 = vector.shape_cast %90 : vector<1x8x32xf32> to vector<8x32xf32>
    %92 = vector.shape_cast %89 : vector<8x32xf32> to vector<1x8x32xf32>
    tpu.vector_store %arg9[%c0_46, %c0_47, %c0_48], %92 {strides = array<i32>} : memref<1x8x32xf32, #tpu.memory_space<vmem>>, vector<1x8x32xf32>,
    return
  }
  func.func @transform_0(%arg0: i32, %arg1: i32) -> (i32, i32, i32) {
    %c0_i32 = arith.constant 0 : i32
    %c0_i32_0 = arith.constant 0 : i32
    return %arg0, %arg1, %c0_i32 : i32, i32, i32
  }
  func.func @transform_1(%arg0: i32, %arg1: i32) -> (i32, i32, i32) {
    %c0_i32 = arith.constant 0 : i32
    %c0_i32_0 = arith.constant 0 : i32
    %c0_i32_1 = arith.constant 0 : i32
    return %arg0, %c0_i32, %c0_i32_0 : i32, i32, i32
  }
  func.func @transform_2(%arg0: i32, %arg1: i32) -> (i32, i32) {
    %c0_i32 = arith.constant 0 : i32
    %c0_i32_0 = arith.constant 0 : i32
    %c0_i32_1 = arith.constant 0 : i32
    return %c0_i32, %c0_i32_0 : i32, i32
  }
  func.func @transform_3(%arg0: i32, %arg1: i32) -> (i32, i32) {
    %c0_i32 = arith.constant 0 : i32
    %c0_i32_0 = arith.constant 0 : i32
    %c0_i32_1 = arith.constant 0 : i32
    return %c0_i32, %c0_i32_0 : i32, i32
  }
  func.func @transform_4(%arg0: i32, %arg1: i32) -> (i32, i32) {
    %c0_i32 = arith.constant 0 : i32
    %c0_i32_0 = arith.constant 0 : i32
    %c0_i32_1 = arith.constant 0 : i32
    return %c0_i32, %c0_i32_0 : i32, i32
  }
  func.func @transform_5(%arg0: i32, %arg1: i32) -> (i32, i32) {
    %c0_i32 = arith.constant 0 : i32
    %c0_i32_0 = arith.constant 0 : i32
    %c0_i32_1 = arith.constant 0 : i32
    return %c0_i32, %c0_i32_0 : i32, i32
  }
  func.func @transform_6(%arg0: i32, %arg1: i32) -> (i32, i32, i32) {
    %c0_i32 = arith.constant 0 : i32
    %c0_i32_0 = arith.constant 0 : i32
    %c0_i32_1 = arith.constant 0 : i32
    return %arg0, %c0_i32, %c0_i32_0 : i32, i32, i32
  }
  func.func @transform_7(%arg0: i32, %arg1: i32) -> (i32, i32, i32) {
    %c0_i32 = arith.constant 0 : i32
    %c0_i32_0 = arith.constant 0 : i32
    return %arg0, %arg1, %c0_i32 : i32, i32, i32
  }
}

</mosaic_0001>

<bundles_post_ra>
// kernel: tpu_custom_call.1
= control target key start
LH: loop header
LB: loop body
LE: loop exit
PB: predicated region body
PF: predicated region fallthrough
CT: control target
= control target key end

     0   :  { %s2357_s0 = inlined_call_operand.hbm [shape: bf16[2,8,32], index: 0, kind: input, shape index: {}]   ;;  %s2358_s1 = inlined_call_operand.hbm [shape: bf16[2,8,32], index: 1, kind: input, shape index: {}]   ;;  %s2359_s2 = inlined_call_operand.hbm [shape: bf16[32,32], index: 2, kind: input, shape index: {}]   ;;  %s2360_s3 = inlined_call_operand.hbm [shape: f32[1,32], index: 3, kind: input, shape index: {}]   ;;  %s2361_s4 = inlined_call_operand.hbm [shape: bf16[32,64], index: 4, kind: input, shape index: {}]   ;;  %s2362_s5 = inlined_call_operand.hbm [shape: f32[1,64], index: 5, kind: input, shape index: {}]   ;;  %s2363_s6 = inlined_call_operand.hbm [shape: f32[2,1,8], index: 6, kind: input, shape index: {}]   ;;  %s2364_s7 = inlined_call_operand.hbm [shape: f32[2,8,32], index: 7, kind: output, shape index: {}]  }
   0x1   :  { %2384 = sst [smem:[#allocation30_spill]] %s2357_s0 }
   0x2   :  { %2385 = sst [smem:[#allocation31_spill]] %s2359_s2 }
   0x3   :  { %2386 = sst [smem:[#allocation32_spill]] %s2360_s3 }
   0x4   :  { %2387 = sst [smem:[#allocation33_spill]] %s2364_s7 }
   0x5   :  { %12 = vsyncpa [#allocation5], 0 }
   0x6   :  { %14 = vsyncpa [#allocation5 + $0x1], 0 }
   0x7   :  { %15 = vsyncpa [#allocation8], 0 }
   0x8   :  { %17 = vsyncpa [#allocation8 + $0x1], 0 }
   0x9   :  { %18 = vsyncpa [#allocation11], 0 }
   0xa   :  { %19 = vsyncpa [#allocation14], 0 }
   0xb   :  { %20 = vsyncpa [#allocation6], 0 }
   0xc   :  { %22 = vsyncpa [#allocation6 + $0x1], 0  ;;  %s1886_s24 = smov 0   ;;  %s1888_s25 = smov 0  }
   0xd   :  { %s1890_s26 = smov 0   ;;  %s1892_s27 = smov 0  }
   0xe   :  { %s1894_s28 = smov 0   ;;  %s1896_s29 = smov 0  }
   0xf LB: > { %2388 = sst [smem:[#allocation24_spill]] %s1802_s24  ;;  %s1917_s30 = sadd.s32 4294967295, %s1822_s29   ;;  %s1822_s29 = sphi %s1896_s29, %s28_s29   ;;  %s1818_s28 = sphi %s1894_s28, %s2437_s28   ;;  %s1814_s27 = sphi %s1892_s27, %s2436_s27   ;;  %s1810_s26 = sphi %s1890_s26, %s2435_s26   ;;  %s1806_s25 = sphi %s1888_s25, %s2434_s25   ;;  %s1802_s24 = sphi %s1886_s24, %s2433_s24  }
  0x10   : > { %2389 = sst [smem:[#allocation25_spill]] %s1814_s27  ;;  %p1237_p0 = scmp.ge.s32.totalorder %s1822_s29, 1 }
  0x11   : > { %p2371_p1 = scmp.eq.s32.totalorder %s1917_s30, 0  ;;  %p237_p2 = scmp.lt.s32.totalorder %s1822_s29, 3 }
  0x12   : > { %s1824_s9 = smov [#allocation9]   ;;  %s1825_s12 = smov [#allocation10]  }
  0x13   : > { %p1922_p3 = pnand %p1237_p0, %p237_p2  ;;  %s249_s10 = sshll.u32 %s1824_s9, 4  ;;  %s1926_s10 = int_to_ptr.vmem [resolvable:$true] %s249_s10 }
  0x14   : > { %s263_s13 = sshll.u32 %s1825_s12, 4  ;;  %s2392_s2 = sld [smem:[#allocation31_spill]]  ;;  %s1937_s13 = int_to_ptr.vmem [resolvable:$true] %s263_s13 }
  0x15   : > { %s2390_s8 = scalar_select %p1922_p3, 1, 0 }
  0x16   : > { %p1391_p4 = pneg %p1922_p3 }
  0x18   : > { %p1933_p6 = pnand %p1391_p4, %p2371_p1 }
  0x1a   : > { %s2391_s11 = scalar_select %p1933_p6, 1, 0 }
  0x1b   : > { %s1518_s16 = scalar_lea.hbm %s2392_s2, 256  ;;  %p1947_p8 = pneg %p1933_p6 }
  0x1c   : > { %p1519_p7 = scmp.ne.s32.totalorder %s2392_s2, %s1518_s16  ;;  %p1525_p11 = scmp.lt.u32.totalorder %s1518_s16, %s2392_s2 }
  0x1d   : > { %s2393_s19 = scalar_select %p1947_p8, 1, 0 }
  0x1e   : > { %p1521_p9 = pnand %p1947_p8, %p1519_p7 }
  0x20   : > { %p1522_p10 = pneg %p1521_p9 }
  0x22   : > { %p1527_p12 = pnand %p1525_p11, %p1522_p10 }
  0x24   : > { %1530 = shalt.err (!%p1527_p12)
}
  0x25   : > { %s1531_s22 = scalar_lea.vmem %s1926_s10, 256  ;;  %p1539_p4 = scmp.lt.s32.totalorder %s1926_s10, %s1926_s10 }
  0x26   : > { %p1532_p13 = scmp.ne.s32.totalorder %s1926_s10, %s1531_s22  ;;  %p1540_p5 = scmp.lt.s32.totalorder %s1531_s22, %s1531_s22 }
  0x28   : > { %p1534_p0 = pnand %p1532_p13, %p1947_p8  ;;  %p1541_p7 = por %p1540_p5, %p1539_p4 }
  0x2a   : > { %p1535_p2 = pneg %p1534_p0 }
  0x2c   : > { %p1542_p9 = pnand %p1541_p7, %p1535_p2 }
  0x2e   : > { %1545 = shalt.err (!%p1542_p9)
}
  0x2f   : > { %s2365_s23 = smov 64   ;;  %s2366_s9 = smov 4  }
  0x30   : > { %1394 = dma.hbm_to_vmem [thread:$0]  (!%p1933_p6), %s2392_s2, 256, %s1926_s10, [#allocation8], %s2365_s23, %s2365_s23, %s2366_s9  }
  0x31   : > { %s2394_s3 = sld [smem:[#allocation32_spill]] }
  0x37   : > { %s1546_s17 = scalar_lea.hbm %s2394_s3, 16 }
  0x38   : > { %p1547_p5 = scmp.ne.s32.totalorder %s2394_s3, %s1546_s17  ;;  %p1553_p12 = scmp.lt.u32.totalorder %s1546_s17, %s2394_s3 }
  0x3a   : > { %p1549_p10 = pnand %p1547_p5, %p1947_p8 }
  0x3c   : > { %p1550_p11 = pneg %p1549_p10 }
  0x3e   : > { %p1555_p13 = pnand %p1553_p12, %p1550_p11 }
  0x40   : > { %1558 = shalt.err (!%p1555_p13)
}
  0x41   : > { %s1559_s10 = scalar_lea.vmem %s1937_s13, 16  ;;  %s1566_s12 = scalar_lea.vmem %s1937_s13, 32 }
  0x42   : > { %p1560_p0 = scmp.ne.s32.totalorder %s1937_s13, %s1559_s10  ;;  %p1567_p7 = scmp.lt.s32.totalorder %s1937_s13, %s1937_s13 }
  0x43   : > { %p1568_p9 = scmp.lt.s32.totalorder %s1566_s12, %s1559_s10 }
  0x44   : > { %p1562_p2 = pnand %p1560_p0, %p1947_p8 }
  0x45   : > { %p1569_p5 = por %p1568_p9, %p1567_p7 }
  0x46   : > { %p1563_p4 = pneg %p1562_p2 }
  0x48   : > { %p1570_p10 = pnand %p1569_p5, %p1563_p4 }
  0x4a   : > { %1573 = shalt.err (!%p1570_p10)
}
  0x4b   : > { %1397 = dma.hbm_to_vmem [thread:$0]  (!%p1933_p6), %s2394_s3, 16, %s1937_s13, [#allocation11]  }
  0x4c   : > { %s1236_s16 = sadd.s32 4294967294, %s1822_s29   ;;  %s40_s17 = sadd.s32 1, %s1818_s28 }
  0x4d   : > { %p42_p11 = scmp.ge.s32.totalorder %s40_s17, 2  ;;  %s49_s18 = sadd.s32 1, %s1810_s26 }
  0x4e   : > { %p56_p12 = scmp.ne.s32.totalorder %s1810_s26, %s1806_s25  ;;  %p57_p13 = scmp.eq.s32.totalorder %s1822_s29, 0 }
  0x4f   : > { %s2439_s17 = smov (%p42_p11, %s40_s17), 0  ;;  %p62_p2 = scmp.ne.s32.totalorder %s1806_s25, %s1802_s24 }
  0x50   : > { %2395 = sst [smem:[#allocation26_spill]] %s2439_s17  ;;  %p2003_p0 = por %p57_p13, %p56_p12 }
  0x51   : > { %s44_s13 = ssub.s32 %s1818_s28, %s2439_s17  ;;  %p224_p4 = scmp.eq.s32.totalorder %s1917_s30, 1 }
  0x52   : > { %p47_p7 = scmp.eq.s32.totalorder %s44_s13, 0  ;;  %p2014_p9 = por %p2371_p1, %p62_p2 }
  0x53   : > { %p2018_p5 = por %p224_p4, %p56_p12  ;;  %p230_p10 = scmp.eq.s32.totalorder %s1236_s16, 1 }
  0x54   : > { %s2397_s21 = scalar_select %p2014_p9, 1, 0 }
  0x55   : > { %s2398_s22 = scalar_select %p2018_p5, 1, 0 }
  0x56   : > { %s2023_s10 = scalar_select %p47_p7, %s1810_s26, %s49_s18  }
  0x57   : > { %2399 = sst [smem:[#allocation27_spill]] %s2398_s22  ;;  %p2025_p11 = por %p230_p10, %p62_p2 }
  0x58   : > { %2400 = sst [smem:[#allocation28_spill]] %s2023_s10  ;;  %p1422_p13 = scmp.lt.s32.totalorder %s1822_s29, 2 }
  0x59   : > { %s2401_s12 = scalar_select %p2025_p11, 1, 0 }
  0x5a   : > { %s2367_s15 = sand.u32 1, %s1810_s26   ;;  %s1244_s23 = sshll.u32 %s1818_s28, 6 }
  0x5b   : > { %2402 = sst [smem:[#allocation29_spill]] %s2401_s12  ;;  %s2034_s13 = sshll.u32 %s2367_s15, 2 }
  0x5c   : > { %s2403_s0 = sld [smem:[#allocation30_spill]]  ;;  %s302_s16 = scalar_lea.vmem [#allocation4], %s2034_s13 }
  0x5d   : > { %s310_s18 = sshll.u32 %s302_s16, 4  ;;  %p2047_p12 = pnand %p1422_p13, %p2003_p0  ;;  %s2043_s18 = int_to_ptr.vmem [resolvable:$true] %s310_s18 }
  0x5e   : > { %s2054_s2 = scalar_lea.hbm %s2358_s1, %s1244_s23  ;;  %s2405_s9 = sand.u32 1, %s1822_s29  }
  0x5f   : > { %s2404_s14 = scalar_select %p2047_p12, 1, 0 }
  0x60   : > { %s2058_s10 = scalar_lea.sflag [#allocation5], %s2405_s9  ;;  %p2064_p4 = pneg %p2047_p12 }
  0x62   : > { %s2040_s3 = scalar_lea.hbm %s2403_s0, %s1244_s23  ;;  %s1579_s17 = scalar_lea.hbm %s2403_s0, 128 }
  0x63   : > { %s1574_s12 = scalar_lea.hbm %s2040_s3, 64  ;;  %p1580_p10 = scmp.lt.u32.totalorder %s2040_s3, %s2403_s0 }
  0x64   : > { %p1575_p2 = scmp.ne.s32.totalorder %s2040_s3, %s1574_s12  ;;  %p1581_p13 = scmp.lt.u32.totalorder %s1579_s17, %s1574_s12 }
  0x65   : > { %p1583_p11 = scmp.lt.u32.totalorder %s1574_s12, %s2040_s3 }
  0x66   : > { %p1577_p0 = pnand %p2064_p4, %p1575_p2  ;;  %p1582_p1 = por %p1581_p13, %p1580_p10 }
  0x68   : > { %p1578_p7 = pneg %p1577_p0  ;;  %p1584_p5 = por %p1583_p11, %p1582_p1 }
  0x6a   : > { %p1585_p9 = pnand %p1584_p5, %p1578_p7 }
  0x6c   : > { %1588 = shalt.err (!%p1585_p9)
}
  0x6d   : > { %s1589_s9 = scalar_lea.vmem %s2043_s18, 64  ;;  %s1828_s24 = smov [#allocation4]  }
  0x6e   : > { %p1590_p2 = scmp.ne.s32.totalorder %s2043_s18, %s1589_s9  ;;  %s1594_s20 = sshll.u32 %s1828_s24, 4  ;;  %s1595_s20 = int_to_ptr.vmem [resolvable:$false] %s1594_s20 }
  0x6f   : > { %s1596_s23 = scalar_lea.vmem %s1595_s20, 128  ;;  %p1597_p6 = scmp.lt.s32.totalorder %s2043_s18, %s1595_s20 }
  0x70   : > { %p1592_p0 = pnand %p1590_p2, %p2064_p4  ;;  %p1598_p8 = scmp.lt.s32.totalorder %s1596_s23, %s1589_s9 }
  0x72   : > { %p1593_p3 = pneg %p1592_p0  ;;  %p1599_p10 = por %p1598_p8, %p1597_p6 }
  0x74   : > { %p1600_p13 = pnand %p1599_p10, %p1593_p3 }
  0x76   : > { %1603 = shalt.err (!%p1600_p13)
}
  0x77   : > { %1407 = dma.hbm_to_vmem [thread:$0]  (!%p2047_p12), %s2040_s3, 64, %s2043_s18, %s2058_s10  }
  0x78   : > { %s1829_s12 = smov [#allocation12]   ;;  %s1830_s15 = smov [#allocation13]  }
  0x79   : > { %s273_s17 = sshll.u32 %s1829_s12, 4  ;;  %s287_s0 = sshll.u32 %s1830_s15, 4  ;;  %s274_s17 = int_to_ptr.vmem [resolvable:$true] %s273_s17  ;;  %s2088_s0 = int_to_ptr.vmem [resolvable:$true] %s287_s0 }
  0x7a   : > { %s1604_s9 = scalar_lea.hbm %s2361_s4, 256  ;;  %p2407_p3 = scmp.ne.s32.totalorder %s2393_s19, 0 }
  0x7b   : > { %p1605_p1 = scmp.ne.s32.totalorder %s2361_s4, %s1604_s9  ;;  %p1611_p9 = scmp.lt.u32.totalorder %s1604_s9, %s2361_s4 }
  0x7d   : > { %p1607_p6 = pnand %p1605_p1, %p2407_p3 }
  0x7f   : > { %p1608_p8 = pneg %p1607_p6 }
  0x81   : > { %p1613_p5 = pnand %p1611_p9, %p1608_p8 }
  0x83   : > { %1616 = shalt.err (!%p1613_p5)
}
  0x84   : > { %s1617_s18 = scalar_lea.vmem %s274_s17, 256  ;;  %p1625_p0 = scmp.lt.s32.totalorder %s274_s17, %s274_s17 }
  0x85   : > { %p1618_p11 = scmp.ne.s32.totalorder %s274_s17, %s1617_s18  ;;  %p1626_p10 = scmp.lt.s32.totalorder %s1617_s18, %s1617_s18 }
  0x87   : > { %p1620_p7 = pnand %p1618_p11, %p2407_p3  ;;  %p1627_p13 = por %p1626_p10, %p1625_p0 }
  0x89   : > { %p1621_p2 = pneg %p1620_p7 }
  0x8b   : > { %p1628_p12 = pnand %p1627_p13, %p1621_p2 }
  0x8d   : > { %1631 = shalt.err (!%p1628_p12)
}
  0x8e   : > { %p2408_p1 = scmp.ne.s32.totalorder %s2391_s11, 0  ;;  %s2409_s7 = smov 4  }
  0x8f   : > { %s2410_s12 = smov 64   ;;  %s1632_s9 = scalar_lea.hbm %s2362_s5, 16 }
  0x90   : > { %1400 = dma.hbm_to_vmem [thread:$0]  (!%p2408_p1), %s2361_s4, 256, %s274_s17, [#allocation11], %s2410_s12, %s2410_s12, %s2409_s7  }
  0x91   : > { %p1633_p6 = scmp.ne.s32.totalorder %s2362_s5, %s1632_s9  ;;  %p1639_p9 = scmp.lt.u32.totalorder %s1632_s9, %s2362_s5 }
  0x93   : > { %p1635_p12 = pnand %p1633_p6, %p2407_p3 }
  0x95   : > { %p1636_p8 = pneg %p1635_p12 }
  0x97   : > { %p1641_p5 = pnand %p1639_p9, %p1636_p8 }
  0x99   : > { %1644 = shalt.err (!%p1641_p5)
}
  0x9a   : > { %s1645_s17 = scalar_lea.vmem %s2088_s0, 16  ;;  %s1652_s7 = scalar_lea.vmem %s2088_s0, 32 }
  0x9b   : > { %p1646_p11 = scmp.ne.s32.totalorder %s2088_s0, %s1645_s17  ;;  %p1653_p0 = scmp.lt.s32.totalorder %s2088_s0, %s2088_s0 }
  0x9c   : > { %p1654_p10 = scmp.lt.s32.totalorder %s1652_s7, %s1645_s17 }
  0x9d   : > { %p1648_p7 = pnand %p1646_p11, %p2407_p3 }
  0x9e   : > { %p1655_p13 = por %p1654_p10, %p1653_p0 }
  0x9f   : > { %p1649_p2 = pneg %p1648_p7 }
  0xa1   : > { %p1656_p6 = pnand %p1655_p13, %p1649_p2 }
  0xa3   : > { %1659 = shalt.err (!%p1656_p6)
}
  0xa4   : > { %1403 = dma.hbm_to_vmem [thread:$0]  (!%p2408_p1), %s2362_s5, 16, %s2088_s0, [#allocation14]  }
  0xa5   : > { %s321_s19 = scalar_lea.vmem [#allocation7], %s2034_s13  ;;  %s1247_s15 = sshll.u32 %s1818_s28, 4 }
  0xa6   : > { %s328_s22 = sshll.u32 %s321_s19, 4  ;;  %s2411_s24 = sand.u32 1, %s1822_s29   ;;  %s2136_s22 = int_to_ptr.vmem [resolvable:$true] %s328_s22 }
  0xa7   : > { %s318_s11 = scalar_lea.sflag [#allocation8], %s2411_s24  ;;  %s1660_s20 = scalar_lea.hbm %s2054_s2, 64 }
  0xa8   : > { %p1661_p3 = scmp.ne.s32.totalorder %s2054_s2, %s1660_s20  ;;  %s1665_s3 = scalar_lea.hbm %s2358_s1, 128 }
  0xa9   : > { %p1666_p1 = scmp.lt.u32.totalorder %s2054_s2, %s2358_s1  ;;  %p1667_p9 = scmp.lt.u32.totalorder %s1665_s3, %s1660_s20 }
  0xaa   : > { %p1663_p12 = pnand %p1661_p3, %p2064_p4  ;;  %p1669_p11 = scmp.lt.u32.totalorder %s1660_s20, %s2054_s2 }
  0xab   : > { %p1668_p5 = por %p1667_p9, %p1666_p1 }
  0xac   : > { %p1664_p8 = pneg %p1663_p12 }
  0xad   : > { %p1670_p7 = por %p1669_p11, %p1668_p5 }
  0xaf   : > { %p1671_p2 = pnand %p1670_p7, %p1664_p8 }
  0xb1   : > { %1674 = shalt.err (!%p1671_p2)
}
  0xb2   : > { %s1675_s0 = scalar_lea.vmem %s2136_s22, 64  ;;  %s1831_s13 = smov [#allocation7]  }
  0xb3   : > { %p1676_p0 = scmp.ne.s32.totalorder %s2136_s22, %s1675_s0  ;;  %s1680_s7 = sshll.u32 %s1831_s13, 4  ;;  %s1681_s7 = int_to_ptr.vmem [resolvable:$false] %s1680_s7 }
  0xb4   : > { %s1682_s27 = scalar_lea.vmem %s1681_s7, 128  ;;  %p1683_p6 = scmp.lt.s32.totalorder %s2136_s22, %s1681_s7 }
  0xb5   : > { %p1678_p10 = pnand %p1676_p0, %p2064_p4  ;;  %p1684_p3 = scmp.lt.s32.totalorder %s1682_s27, %s1675_s0 }
  0xb7   : > { %p1679_p13 = pneg %p1678_p10  ;;  %p1685_p12 = por %p1684_p3, %p1683_p6 }
  0xb9   : > { %p1686_p1 = pnand %p1685_p12, %p1679_p13 }
  0xbb   : > { %1689 = shalt.err (!%p1686_p1)
}
  0xbc   : > { %p2412_p8 = scmp.ne.s32.totalorder %s2404_s14, 0  ;;  %s2167_s24 = scalar_lea.hbm %s2363_s6, %s1247_s15 }
  0xbd   : > { %s2413_s20 = sand.u32 1, %s1810_s26   ;;  %s1690_s3 = scalar_lea.hbm %s2167_s24, 16 }
  0xbe   : > { %1410 = dma.hbm_to_vmem [thread:$0]  (!%p2412_p8), %s2054_s2, 64, %s2136_s22, %s318_s11  }
  0xbf   : > { %s338_s9 = scalar_lea.vmem [#allocation15], %s2413_s20  ;;  %p1691_p9 = scmp.ne.s32.totalorder %s2167_s24, %s1690_s3 }
  0xc0   : > { %s345_s23 = sshll.u32 %s338_s9, 4  ;;  %s1695_s11 = scalar_lea.hbm %s2363_s6, 32  ;;  %s346_s23 = int_to_ptr.vmem [resolvable:$true] %s345_s23 }
  0xc1   : > { %p1693_p5 = pnand %p1691_p9, %p2064_p4  ;;  %p1696_p7 = scmp.lt.u32.totalorder %s2167_s24, %s2363_s6 }
  0xc2   : > { %p1697_p2 = scmp.lt.u32.totalorder %s1695_s11, %s1690_s3  ;;  %p1699_p10 = scmp.lt.u32.totalorder %s1690_s3, %s2167_s24 }
  0xc3   : > { %p1694_p11 = pneg %p1693_p5 }
  0xc4   : > { %p1698_p0 = por %p1697_p2, %p1696_p7 }
  0xc6   : > { %p1700_p13 = por %p1699_p10, %p1698_p0 }
  0xc8   : > { %p1701_p6 = pnand %p1700_p13, %p1694_p11 }
  0xca   : > { %1704 = shalt.err (!%p1701_p6)
}
  0xcb   : > { %s1705_s17 = scalar_lea.vmem %s346_s23, 16  ;;  %s1832_s0 = smov [#allocation15]  }
  0xcc   : > { %p1706_p3 = scmp.ne.s32.totalorder %s346_s23, %s1705_s17  ;;  %s1710_s13 = sshll.u32 %s1832_s0, 4  ;;  %s1711_s13 = int_to_ptr.vmem [resolvable:$false] %s1710_s13 }
  0xcd   : > { %s1712_s7 = scalar_lea.vmem %s1711_s13, 32  ;;  %p1713_p9 = scmp.lt.s32.totalorder %s346_s23, %s1711_s13 }
  0xce   : > { %p1708_p12 = pnand %p1706_p3, %p2064_p4  ;;  %p1714_p5 = scmp.lt.s32.totalorder %s1712_s7, %s1705_s17 }
  0xd0   : > { %p1709_p1 = pneg %p1708_p12  ;;  %p1715_p8 = por %p1714_p5, %p1713_p9 }
  0xd2   : > { %p1716_p2 = pnand %p1715_p8, %p1709_p1 }
  0xd4   : > { %1719 = shalt.err (!%p1716_p2)
}
  0xd5   : > { %p2414_p7 = scmp.ne.s32.totalorder %s2404_s14, 0  ;;  %p2415_p11 = scmp.ne.s32.totalorder %s2390_s8, 0 }
  0xd6   : > { %s356_s16 = sand.u32 (!%p2415_p11), 1, %s1917_s30   ;;  %s2193_s27 = sand.u32 (!%p2415_p11), 1, %s1806_s25  }
  0xd7   : > { %1413 = dma.hbm_to_vmem [thread:$0]  (!%p2414_p7), %s2167_s24, 16, %s346_s23, %s2058_s10  }
  0xd8   : > { %354 = sbr.rel (%p2415_p11) target bundleno = 1501 (0x5dd), region = 48  ;;  %s1249_s12 = sshll.u32 (!%p2415_p11), %s2193_s27, 2 }
  0xd9   : > { %s357_s19 = scalar_lea.sflag (!%p2415_p11), [#allocation5], %s356_s16  ;;  %s2196_s20 = scalar_lea.vmem (!%p2415_p11), [#allocation4], %s1249_s12 }
  0xda   : > { %p2416_p4 = scmp.ne.s32.totalorder (!%p2415_p11), %s2397_s21, 0 }
  0xdf   : > { %1773 = dma.done.wait (%p2416_p4), %s357_s19, 64  }
  0xe0   : > { %1775 = vsyncadd (%p2416_p4), %s357_s19, 4294967232  ;;  %s366_s10 = scalar_lea.sflag [#allocation8], %s356_s16  ;;  %s369_s8 = scalar_lea.vmem [#allocation7], %s1249_s12 }
  0xe1   : > { %1777 = dma.done.wait (%p2416_p4), %s366_s10, 64  }
  0xe2   : > { %1779 = vsyncadd (%p2416_p4), %s366_s10, 4294967232  ;;  %p2417_p8 = scmp.eq.s32.totalorder %s1917_s30, 0 }
  0xe4   : > { %1781 = dma.done.wait (%p2417_p8), [#allocation8], 256   ;;  %p2418_p0 = pmov %p2417_p8 }
  0xe6   : > { %1783 = vsyncadd (%p2418_p0), [#allocation8], 4294967040  ;;  %p2419_p10 = pmov %p2418_p0 }
  0xe7   : > { %p2420_p13 = pmov %p2418_p0 }
  0xe8   : > { %1785 = dma.done.wait (%p2419_p10), [#allocation11], 272  }
  0xe9   : > { %1787 = vsyncadd (%p2420_p13), [#allocation11], 4294967024  ;;  %p2421_p6 = pmov %p2418_p0 }
  0xea   : > { %p2422_p3 = pmov %p2418_p0 }
  0xeb   : > { %1789 = dma.done.wait (%p2421_p6), [#allocation14], 16  }
  0xec   : > { %1791 = vsyncadd (%p2422_p3), [#allocation14], 4294967280  ;;  %s393_s14 = scalar_lea.vmem [#allocation15], %s2193_s27 }
  0xed   : > { %1793 = dma.done.wait (%p2416_p4), %s357_s19, 16  }
  0xee   : > { %1795 = vsyncadd (%p2416_p4), %s357_s19, 4294967280  ;;  %v1833_v0 = vmov 0.0   ;;  %vm1834_vm0 = vmmov 0   ;;  %v1494_v1 = vld [vmem:[#allocation12] sm:$0xff]   ;;  %v1495_v2 = vld [vmem:[#allocation12 + $0x8] sm:$0xff]   ;;  %vm463_vm1 = vcmask 261120  }
  0xef   : > { %1303 = vmatprep.subr.bf16.mxu0 %v1833_v0  ;;  %1307 = vmatprep.mubr.msk.bf16.mxu0 %vm1834_vm0, %v1833_v0  ;;  %v1496_v3 = vld [vmem:[#allocation9] sm:$0xff]   ;;  %v1497_v4 = vld [vmem:[#allocation9 + $0x8] sm:$0xff]   ;;  %v439_v5 = vld [vmem:[%s369_s8] sm:$0xf]  ;;  %vm508_vm2 = vcmask 519168   ;;  %vm587_vm3 = vcmask 64512  }
  0xf0   : > { %1311 = vmatprep.subr.bf16.mxu1 %v1833_v0  ;;  %1315 = vmatprep.mubr.msk.bf16.mxu1 %vm1834_vm0, %v1833_v0  ;;  %v510_v6 = vld [vmem:[%s2196_s20] sm:$0xf]  ;;  %v1256_v7 = vld [vmem:[#allocation13] ss:$0 sm:$0xff]  ;;  %s1835_s30 = smov 112   ;;  %s1836_s21 = smov 120  }
  0xf1   : > { %1304 = vmatpush3.bf16.msra.mxu0 %v1494_v1  ;;  %1312 = vmatpush3.bf16.msra.mxu1 %v1496_v3  ;;  %v1260_v14 = vld [vmem:[#allocation10] ss:$0 sm:$0xff]  ;;  %s1837_s24 = smov 104   ;;  %v1264_v36 = vld [vmem:[%s393_s14] ss:$0 sm:$0xff]  ;;  %s1838_s9 = smov 96  }
  0xf2   : > { %1305 = vmatprep.subr.bf16.mxu0 %v1833_v0  ;;  %1313 = vmatprep.subr.bf16.mxu1 %v1833_v0  ;;  %s1839_s23 = smov 80   ;;  %vm654_vm4 = vcmask 1043456   ;;  %s1840_s3 = smov 72   ;;  %vm818_vm5 = vcmask 130112   ;;  %vm938_vm6 = vcmask 195712   ;;  %vm1058_vm7 = vcmask 261312  }
  0xf3   : > { %s1841_s2 = smov 88   ;;  %s1842_s22 = smov 8  }
  0xf4   : > { %s1843_s11 = smov 16   ;;  %s2423_s18 = sld [smem:[#allocation25_spill]] }
  0xf5   : > { %1306 = vmatpush3.bf16.msra.mxu0 %v1495_v2  ;;  %1314 = vmatpush3.bf16.msra.mxu1 %v1497_v4  ;;  %s1844_s15 = smov 24   ;;  %s2424_s17 = sld [smem:[#allocation27_spill]] }
  0xf6   : > { %1319 = vmatprep.subr.bf16.mxu0 %v1833_v0  ;;  %1325 = vmatprep.subr.bf16.mxu1 %v1833_v0  ;;  %s1255_s0 = sshll.u32 %s2193_s27, 3  ;;  %s2425_s20 = sld [smem:[#allocation33_spill]] }
  0xf7   : > { %s432_s7 = scalar_lea.vmem [#allocation16], %s1255_s0  ;;  %s1063_s8 = scalar_lea.sflag [#allocation6], %s2193_s27 }
  0xf8   : > { %1308 = vmatmul.mubr.msk.bf16.vlgmr.msra.gmra.mrb[0].mxu0 %vm463_vm1, %v439_v5  ;;  %1316 = vmatmul.mubr.msk.bf16.vlgmr.msra.gmra.mrb[0].mxu1 %vm463_vm1, %v510_v6  ;;  %s1077_s16 = sshll.u32 %s432_s7, 4  ;;  %s2309_s16 = int_to_ptr.vmem [resolvable:$true] %s1077_s16 }
  0xf9   : > { %1321 = vmatprep.mubr.msk.bf16.mxu0 %vm1834_vm0, %v1833_v0  ;;  %1327 = vmatprep.mubr.msk.bf16.mxu1 %vm1834_vm0, %v1833_v0  ;;  %s1720_s14 = scalar_lea.vmem %s2309_s16, 128 }
  0xfa   : > { %s1278_s13 = sshll.u32 %s2423_s18, 7  ;;  %p1721_p12 = scmp.ne.s32.totalorder %s2309_s16, %s1720_s14 }
  0xfb   : > { %p2426_p1 = scmp.ne.s32.totalorder %s2424_s17, 0 }
  0xfc   : > { %s2307_s10 = scalar_lea.hbm %s2425_s20, %s1278_s13 }
  0xfd   : > { %p1722_p9 = pnand %p1721_p12, %p2426_p1 }
  0xff   : > { %p1723_p5 = pneg %p1722_p9 }
 0x1cb   : > { %v501_v8 = vpop.f32.mrb[0].mxu0  ;;  %v572_v15 = vpop.f32.mrb[0].mxu1 }
 0x1cc   : > { %v502_v9 = vadd.f32 %v1256_v7, %v501_v8  ;;  %v1309_v10 = vpop.f32.mrb[1].mxu0  ;;  %v1317_v16 = vpop.f32.mrb[1].mxu1  ;;  %v573_v18 = vadd.f32 %v1260_v14, %v572_v15 }
 0x1cd   : > { %v504_v11 = vpop.f32.mrb[2].mxu0  ;;  %v575_v17 = vpop.f32.mrb[2].mxu1 }
 0x1ce   : > { %v507_v12 = vpack.c.bf16 %v502_v9, %v502_v9  ;;  %v1310_v13 = vpop.f32.mrb[3].mxu0  ;;  %v1318_v19 = vpop.f32.mrb[3].mxu1  ;;  %v578_v20 = vmul.f32 0.35355318, %v573_v18 }
 0x1d0   : > { %509 = vst.msk [vmem:[#allocation2] sm:$0xf] %vm508_vm2, %v507_v12  ;;  %v579_v25 = vpack.c.bf16 %v578_v20, %v578_v20 }
 0x1d7   : > { %v2240_v21 = vld [vmem:[#allocation2] sm:$0xf] }
 0x1d8   : > { %v2242_v22 = vld [vmem:[#allocation2] ss:$0 sps:$4 sm:$0xff]   ;;  %v592_v23 = vsel %vm587_vm3, %v2240_v21, 0  ;;  %v1266_v3 = vcombine.low %v2240_v21, %v2240_v21 }
 0x1d9   : > { %v2246_v24 = vld [vmem:[#allocation2] ss:$0 sps:$4 sm:$0xff]   ;;  %1320 = vmatpush3.bf16.xpose.msra.mxu0 %v592_v23  ;;  %826 = vrot.lane.b32.xlu1 %v2242_v22, %s1835_s30 }
 0x1da   : > { %706 = vrot.lane.b32.xlu0 %v2246_v24, %s1836_s21  ;;  %1331 = vmatprep.subr.bf16.mxu0 %v1833_v0  ;;  %v2252_v26 = vld [vmem:[#allocation2] ss:$0 sps:$4 sm:$0xff]  }
 0x1dd   : > { %821 = vrot.lane.b32.xlu1 %v579_v25, %s1835_s30  ;;  %s1845_s30 = smov [#allocation16]  }
 0x1de   : > { %701 = vrot.lane.b32.xlu0 %v579_v25, %s1836_s21  ;;  %s1724_s21 = sshll.u32 %s1845_s30, 4  ;;  %s1725_s21 = int_to_ptr.vmem [resolvable:$false] %s1724_s21 }
 0x1df   : > { %p1727_p2 = scmp.lt.s32.totalorder %s2309_s16, %s1725_s21 }
 0x1e0   : > { %1322 = vmatmul.mubr.msk.bf16.vlgmr.msra.gmra.mrb[4].mxu0 %vm587_vm3, %v579_v25 }
 0x1e1   : > { %941 = vrot.lane.b32.xlu1 %v579_v25, %s1837_s24  ;;  %1333 = vmatprep.mubr.msk.bf16.mxu0 %vm1834_vm0, %v1833_v0 }
 0x1e2   : > { %946 = vrot.lane.b32.xlu0 %v2252_v26, %s1837_s24  ;;  %s1726_s24 = scalar_lea.vmem %s1725_s21, 256 }
 0x1e3   : > { %p1728_p7 = scmp.lt.s32.totalorder %s1726_s24, %s1720_s14 }
 0x1e5   : > { %p1729_p11 = por %p1728_p7, %p1727_p2 }
 0x1e7   : > { %p1730_p4 = pnand %p1729_p11, %p1723_p5 }
 0x24b   : > { %v827_v29 = vpop.permute.xlu1 %826 }
 0x24c   : > { %v707_v27 = vpop.permute.xlu0 %706  ;;  %v832_v31 = vsel %vm587_vm3, %v827_v29, 0 }
 0x24d   : > { %v712_v28 = vsel %vm587_vm3, %v707_v27, 0 }
 0x24e   : > { %1332 = vmatpush3.bf16.xpose.msra.mxu0 %v712_v28 }
 0x24f   : > { %1343 = vmatprep.subr.bf16.mxu0 %v1833_v0  ;;  %v822_v33 = vpop.permute.xlu1 %821 }
 0x250   : > { %v702_v30 = vpop.permute.xlu0 %701 }
 0x253   : > { %v942_v35 = vpop.permute.xlu1 %941 }
 0x254   : > { %v947_v32 = vpop.permute.xlu0 %946 }
 0x255   : > { %1334 = vmatmul.mubr.msk.bf16.vlgmr.msra.gmra.mrb[8].mxu0 %vm587_vm3, %v702_v30  ;;  %v952_v34 = vsel %vm587_vm3, %v947_v32, 0 }
 0x256   : > { %1344 = vmatpush3.bf16.xpose.msra.mxu0 %v832_v31  ;;  %1345 = vmatprep.mubr.msk.bf16.mxu0 %vm1834_vm0, %v1833_v0 }
 0x257   : > { %1355 = vmatprep.subr.bf16.mxu0 %v1833_v0 }
 0x25d   : > { %1346 = vmatmul.mubr.msk.bf16.vlgmr.msra.gmra.mrb[12].mxu0 %vm587_vm3, %v822_v33 }
 0x25e   : > { %1356 = vmatpush3.bf16.xpose.msra.mxu0 %v952_v34  ;;  %1357 = vmatprep.mubr.msk.bf16.mxu0 %vm1834_vm0, %v1833_v0 }
 0x265   : > { %1358 = vmatmul.mubr.msk.bf16.vlgmr.msra.gmra.mrb[16].mxu0 %vm587_vm3, %v942_v35 }
 0x2b3   : > { %v628_v37 = vpop.f32.mrb[4].mxu0 }
 0x2b4   : > { %v629_v38 = vadd.f32 %v1264_v36, %v628_v37  ;;  %v1323_v39 = vpop.f32.mrb[5].mxu0 }
 0x2b5   : > { %v631_v40 = vpop.f32.mrb[6].mxu0 }
 0x2b6   : > { %v1324_v41 = vpop.f32.mrb[7].mxu0  ;;  %v634_v42 = vsel %vm587_vm3, %v629_v38, -inf }
 0x2b7   : > { %635 = vmax.xlane.f32.xlu0 %v634_v42 }
 0x328   : > { %v748_v43 = vpop.f32.mrb[8].mxu0 }
 0x329   : > { %v749_v44 = vadd.f32 %v1264_v36, %v748_v43  ;;  %v1335_v45 = vpop.f32.mrb[9].mxu0 }
 0x32a   : > { %v751_v46 = vpop.f32.mrb[10].mxu0 }
 0x32b   : > { %v1336_v47 = vpop.f32.mrb[11].mxu0  ;;  %v754_v48 = vsel %vm587_vm3, %v749_v44, -inf }
 0x32c   : > { %755 = vmax.xlane.f32.xlu1 %v754_v48 }
 0x330   : > { %v868_v49 = vpop.f32.mrb[12].mxu0 }
 0x331   : > { %v869_v50 = vadd.f32 %v1264_v36, %v868_v49  ;;  %v1347_v51 = vpop.f32.mrb[13].mxu0 }
 0x332   : > { %v871_v52 = vpop.f32.mrb[14].mxu0 }
 0x333   : > { %v1348_v53 = vpop.f32.mrb[15].mxu0  ;;  %v874_v54 = vsel %vm587_vm3, %v869_v50, -inf }
 0x334   : > { %875 = vmax.xlane.f32.xlu0 %v874_v54 }
 0x338   : > { %v988_v55 = vpop.f32.mrb[16].mxu0 }
 0x339   : > { %v989_v56 = vadd.f32 %v1264_v36, %v988_v55  ;;  %v1359_v57 = vpop.f32.mrb[17].mxu0 }
 0x33a   : > { %v991_v58 = vpop.f32.mrb[18].mxu0 }
 0x33b   : > { %v1360_v59 = vpop.f32.mrb[19].mxu0  ;;  %v994_v60 = vsel %vm587_vm3, %v989_v56, -inf }
 0x33c   : > { %995 = vmax.xlane.f32.xlu0 %v994_v60 }
 0x344   : > { %v636_v61 = vpop.xlane.xlu0 %635 }
 0x345   : > { %v637_v62 = vsub.f32 %v629_v38, %v636_v61 }
 0x347   : > { %v638_v63 = vmul.f32 1.442695, %v637_v62 }
 0x349   : > { %1502 = vpow2.f32 %v638_v63 }
 0x353   : > { %v1503_v1 = vpop.eup %1502 }
 0x354   : > { %v640_v2 = vsel %vm587_vm3, %v1503_v1, 0.0 }
 0x355   : > { %641 = vadd.xlane.f32.xlu1 %v640_v2 }
 0x366   : > { %649 = vrot.lane.b32.xlu1 %v1266_v3, %s1838_s9 }
 0x3b9   : > { %v756_v4 = vpop.xlane.xlu1 %755 }
 0x3ba   : > { %v757_v5 = vsub.f32 %v749_v44, %v756_v4 }
 0x3bc   : > { %v758_v6 = vmul.f32 1.442695, %v757_v5 }
 0x3be   : > { %1504 = vpow2.f32 %v758_v6 }
 0x3c1   : > { %v876_v7 = vpop.xlane.xlu0 %875 }
 0x3c2   : > { %v877_v8 = vsub.f32 %v869_v50, %v876_v7 }
 0x3c4   : > { %v878_v9 = vmul.f32 1.442695, %v877_v8 }
 0x3c6   : > { %1506 = vpow2.f32 %v878_v9 }
 0x3c8   : > { %v1505_v10 = vpop.eup %1504 }
 0x3c9   : > { %v996_v11 = vpop.xlane.xlu0 %995  ;;  %v760_v12 = vsel %vm587_vm3, %v1505_v10, 0.0 }
 0x3ca   : > { %v997_v13 = vsub.f32 %v989_v56, %v996_v11  ;;  %761 = vadd.xlane.f32.xlu0 %v760_v12 }
 0x3cc   : > { %v998_v14 = vmul.f32 1.442695, %v997_v13 }
 0x3ce   : > { %1508 = vpow2.f32 %v998_v14 }
 0x3d0   : > { %v1507_v15 = vpop.eup %1506 }
 0x3d1   : > { %v880_v16 = vsel %vm587_vm3, %v1507_v15, 0.0 }
 0x3d2   : > { %881 = vadd.xlane.f32.xlu1 %v880_v16 }
 0x3d8   : > { %v1509_v17 = vpop.eup %1508 }
 0x3d9   : > { %v1000_v18 = vsel %vm587_vm3, %v1509_v17, 0.0 }
 0x3da   : > { %1001 = vadd.xlane.f32.xlu0 %v1000_v18 }
 0x3e2   : > { %v642_v19 = vpop.xlane.xlu1 %641 }
 0x3e3   : > { %1510 = vrcp.f32 %v642_v19  ;;  %886 = vrot.lane.b32.xlu1 %v2242_v22, %s1839_s23 }
 0x3e6   : > { %v650_v20 = vpop.permute.xlu1 %649 }
 0x3e7   : > { %v656_v21 = vsel %vm654_vm4, %v650_v20, 0  ;;  %1006 = vrot.lane.b32.xlu1 %v2252_v26, %s1840_s3 }
 0x3e8   : > { %1326 = vmatpush3.bf16.msra.mxu1 %v656_v21 }
 0x3e9   : > { %1337 = vmatprep.subr.bf16.mxu1 %v1833_v0 }
 0x3ed   : > { %v1511_v23 = vpop.eup %1510 }
 0x3ee   : > { %v644_v25 = vmul.f32 %v1511_v23, %v1503_v1 }
 0x3f0   : > { %766 = vrot.lane.b32.xlu0 %v2246_v24, %s1841_s2  ;;  %v645_v27 = vpack.c.bf16 %v644_v25, %v644_v25 }
 0x3f2   : > { %1328 = vmatmul.mubr.msk.bf16.vlgmr.msra.gmra.mrb[4].mxu1 %vm587_vm3, %v645_v27 }
 0x3f3   : > { %1339 = vmatprep.mubr.msk.bf16.mxu1 %vm1834_vm0, %v1833_v0 }
 0x457   : > { %v762_v22 = vpop.xlane.xlu0 %761 }
 0x458   : > { %1512 = vrcp.f32 %v762_v22 }
 0x45f   : > { %v882_v28 = vpop.xlane.xlu1 %881 }
 0x460   : > { %1514 = vrcp.f32 %v882_v28 }
 0x462   : > { %v1513_v29 = vpop.eup %1512 }
 0x463   : > { %v764_v30 = vmul.f32 %v1513_v29, %v1505_v10  ;;  %v887_v33 = vpop.permute.xlu1 %886 }
 0x464   : > { %v892_v35 = vsel %vm654_vm4, %v887_v33, 0 }
 0x465   : > { %v765_v24 = vpack.c.bf16 %v764_v30, %v764_v30 }
 0x467   : > { %v1002_v26 = vpop.xlane.xlu0 %1001  ;;  %v1007_v37 = vpop.permute.xlu1 %1006 }
 0x468   : > { %1516 = vrcp.f32 %v1002_v26  ;;  %v1012_v40 = vsel %vm654_vm4, %v1007_v37, 0 }
 0x46a   : > { %v1515_v34 = vpop.eup %1514 }
 0x46b   : > { %v767_v31 = vpop.permute.xlu0 %766  ;;  %v884_v36 = vmul.f32 %v1515_v34, %v1507_v15 }
 0x46c   : > { %v772_v32 = vsel %vm654_vm4, %v767_v31, 0 }
 0x46d   : > { %1338 = vmatpush3.bf16.msra.mxu1 %v772_v32  ;;  %v885_v38 = vpack.c.bf16 %v884_v36, %v884_v36 }
 0x46e   : > { %1349 = vmatprep.subr.bf16.mxu1 %v1833_v0 }
 0x470   : > { %1340 = vmatmul.mubr.msk.bf16.vlgmr.msra.gmra.mrb[8].mxu1 %vm587_vm3, %v765_v24 }
 0x471   : > { %1350 = vmatpush3.bf16.msra.mxu1 %v892_v35  ;;  %1351 = vmatprep.mubr.msk.bf16.mxu1 %vm1834_vm0, %v1833_v0 }
 0x472   : > { %1361 = vmatprep.subr.bf16.mxu1 %v1833_v0  ;;  %v1517_v39 = vpop.eup %1516 }
 0x473   : > { %v1004_v41 = vmul.f32 %v1517_v39, %v1509_v17 }
 0x475   : > { %v1005_v42 = vpack.c.bf16 %v1004_v41, %v1004_v41 }
 0x478   : > { %1352 = vmatmul.mubr.msk.bf16.vlgmr.msra.gmra.mrb[12].mxu1 %vm587_vm3, %v885_v38 }
 0x479   : > { %1362 = vmatpush3.bf16.msra.mxu1 %v1012_v40  ;;  %1363 = vmatprep.mubr.msk.bf16.mxu1 %vm1834_vm0, %v1833_v0 }
 0x480   : > { %1364 = vmatmul.mubr.msk.bf16.vlgmr.msra.gmra.mrb[16].mxu1 %vm587_vm3, %v1005_v42 }
 0x4c5   : > { %v692_v43 = vpop.f32.mrb[4].mxu1 }
 0x4c6   : > { %698 = vst.msk [vmem:[#allocation3] sm:$0xff] %vm587_vm3, %v692_v43  ;;  %v1329_v44 = vpop.f32.mrb[5].mxu1 }
 0x4c7   : > { %v695_v45 = vpop.f32.mrb[6].mxu1 }
 0x4c8   : > { %v1330_v46 = vpop.f32.mrb[7].mxu1 }
 0x543   : > { %v808_v47 = vpop.f32.mrb[8].mxu1 }
 0x544   : > { %815 = vrot.lane.b32.xlu0 %v808_v47, %s1842_s22  ;;  %v1341_v48 = vpop.f32.mrb[9].mxu1 }
 0x545   : > { %v811_v49 = vpop.f32.mrb[10].mxu1 }
 0x546   : > { %v1342_v50 = vpop.f32.mrb[11].mxu1 }
 0x54b   : > { %v928_v51 = vpop.f32.mrb[12].mxu1 }
 0x54c   : > { %935 = vrot.lane.b32.xlu1 %v928_v51, %s1843_s11  ;;  %v1353_v0 = vpop.f32.mrb[13].mxu1 }
 0x54d   : > { %v931_v52 = vpop.f32.mrb[14].mxu1 }
 0x54e   : > { %v1354_v53 = vpop.f32.mrb[15].mxu1 }
 0x553   : > { %v1048_v54 = vpop.f32.mrb[16].mxu1 }
 0x554   : > { %1055 = vrot.lane.b32.xlu0 %v1048_v54, %s1844_s15  ;;  %v1365_v55 = vpop.f32.mrb[17].mxu1 }
 0x555   : > { %v1051_v56 = vpop.f32.mrb[18].mxu1 }
 0x556   : > { %v1366_v57 = vpop.f32.mrb[19].mxu1 }
 0x5b6   : > { %v816_v58 = vpop.permute.xlu0 %815 }
 0x5b7   : > { %819 = vst.msk [vmem:[#allocation3] sm:$0xff] %vm818_vm5, %v816_v58 }
 0x5be   : > { %v936_v59 = vpop.permute.xlu1 %935 }
 0x5bf   : > { %939 = vst.msk [vmem:[#allocation3] sm:$0xff] %vm938_vm6, %v936_v59 }
 0x5c6   : > { %v1056_v60 = vpop.permute.xlu0 %1055 }
 0x5c7   : > { %1059 = vst.msk [vmem:[#allocation3] sm:$0xff] %vm1058_vm7, %v1056_v60 }
 0x5ce   : > { %v1060_v61 = vld [vmem:[#allocation3] sm:$0xff] }
 0x5cf   : > { %1061 = vst.msk [vmem:[%s432_s7] sm:$0xff] %vm463_vm1, %v1060_v61 }
 0x5d0   : > { %1733 = shalt.err (!%p1730_p4)
}
 0x5d1   : > { %s1734_s27 = scalar_lea.hbm %s2307_s10, 128  ;;  %s1738_s3 = scalar_lea.hbm %s2425_s20, 256 }
 0x5d2   : > { %p1735_p8 = scmp.ne.s32.totalorder %s2307_s10, %s1734_s27  ;;  %p1739_p13 = scmp.lt.u32.totalorder %s2307_s10, %s2425_s20 }
 0x5d3   : > { %p1740_p6 = scmp.lt.u32.totalorder %s1738_s3, %s1734_s27  ;;  %p1742_p12 = scmp.lt.u32.totalorder %s1734_s27, %s2307_s10 }
 0x5d4   : > { %p1736_p0 = pnand %p1735_p8, %p2426_p1 }
 0x5d5   : > { %p1741_p3 = por %p1740_p6, %p1739_p13 }
 0x5d6   : > { %p1737_p10 = pneg %p1736_p0 }
 0x5d7   : > { %p1743_p9 = por %p1742_p12, %p1741_p3 }
 0x5d9   : > { %p1744_p5 = pnand %p1743_p9, %p1737_p10 }
 0x5db   : > { %1747 = shalt.err (!%p1744_p5)
}
 0x5dc   : > { %1389 = dma.vmem_to_hbm [thread:$0]  (%p2426_p1), %s2309_s16, 128, %s2307_s10, %s1063_s8  }
 0x5dd PF: > { %s2427_s11 = sld [smem:[#allocation24_spill]]  ;;  %s2428_s18 = sld [smem:[#allocation29_spill]] }
 0x5de   : > { %p2430_p7 = scmp.ge.s32.totalorder %s1822_s29, 2 }
 0x5e3   : > { %s1089_s15 = sand.u32 1, %s2427_s11   ;;  %p2429_p2 = scmp.ne.s32.totalorder %s2428_s18, 0 }
 0x5e4   : > { %s1090_s0 = scalar_lea.sflag [#allocation6], %s1089_s15 }
 0x5e5   : > { %p1415_p11 = pnand %p2430_p7, %p2429_p2 }
 0x5e7   : > { %1797 = dma.done.wait (!%p1415_p11), %s1090_s0, 128  }
 0x5e8   : > { %1799 = vsyncadd (!%p1415_p11), %s1090_s0, 4294967168  ;;  %s28_s29 = sadd.s32 1, %s1822_s29   ;;  %s2431_s17 = sld [smem:[#allocation28_spill]] }
 0x5e9   : > { %p25_p4 = scmp.ge.s32.totalorder %s28_s29, 4   ;;  %s2432_s13 = sld [smem:[#allocation26_spill]] }
 0x5ea   : > { %s2433_s24 = smov %s1806_s25  ;;  %s2434_s25 = smov %s1810_s26 }
 0x5eb   : > { %s2436_s27 = smov %s1818_s28  ;;  %27 = sbr.rel (!%p25_p4) target bundleno = 15 (0xf), region = 137 }
 0x5ee   : > { %s2435_s26 = smov %s2431_s17 }
 0x5ef   : > { %s2437_s28 = smov %s2432_s13 }
 0x5f2   :  { %1095 = vsyncpa [#allocation5], 1 }
 0x5f3   :  { %1097 = vsyncpa [#allocation5 + $0x1], 1 }
 0x5f4   :  { %1098 = vsyncpa [#allocation8], 1 }
 0x5f5   :  { %1100 = vsyncpa [#allocation8 + $0x1], 1 }
 0x5f6   :  { %1101 = vsyncpa [#allocation11], 1 }
 0x5f7   :  { %1102 = vsyncpa [#allocation14], 1 }
 0x5f8   :  { %1103 = vsyncpa [#allocation6], 1 }
 0x5f9   :  { %1105 = vsyncpa [#allocation6 + $0x1], 1 }

</bundles_post_ra>
